<compile_context>
chip_gen: v6e
topology: v6e:2x2x1
jax: 0.10.0
libtpu: 0.0.40
codegen_flags: <defaults>
</compile_context>

<pallas_src>
import functools
from typing import NamedTuple

import jax
import jax.numpy as jnp
from jax import lax
from jax.experimental import pallas as pl
from jax.experimental.pallas import tpu as pltpu

EPS = 1e-5
LANE = 128
VMEM_LIMIT_BYTES = 48 * 1024 * 1024      # headroom under v7x's 64 MiB VMEM
FUSED_PATH_MAX_BYTES = 24 * 1024 * 1024  # switch to the tiled path above this


def _round_up(n, m):
    return ((n + m - 1) // m) * m


def _pad_cols(v, width):
    pad = width - v.shape[-1]
    return v if pad == 0 else jnp.pad(v, ((0, 0), (0, pad)))


# ----------------------------------------------------------------------------
# Kernels
# ----------------------------------------------------------------------------
def _fused_kernel(x_ref, w0_ref, w1_ref, vec_ref, out_ref):
    """Small-batch path: whole batch resident in VMEM, single grid point."""
    x = x_ref[...].astype(jnp.float32)
    bsz, d_in = x.shape
    hp = w0_ref.shape[1]
    dp_out = w1_ref.shape[1]
    inv_b = 1.0 / bsz

    # Packed parameter rows: [g0, b0, bias0, g1, b1, bias1]
    g0 = vec_ref[0:1, :d_in]
    b0 = vec_ref[1:2, :d_in]
    bias0 = vec_ref[2:3, :hp]
    g1 = vec_ref[3:4, :hp]
    b1 = vec_ref[4:5, :hp]
    bias1 = vec_ref[5:6, :dp_out]

    # BatchNorm1d(input): single-pass batch stats (f32 accumulation), folded
    # into one multiply-add.  var = E[x^2] - mean^2, clamped at 0 for safety.
    mean0 = jnp.sum(x, axis=0, keepdims=True) * inv_b
    var0 = jnp.maximum(
        jnp.sum(x * x, axis=0, keepdims=True) * inv_b - mean0 * mean0, 0.0)
    scale0 = g0 * lax.rsqrt(var0 + EPS)
    shift0 = b0 - mean0 * scale0

    # Linear0 + ReLU (bf16 MXU operands, f32 accumulate).
    h = jnp.dot((x * scale0 + shift0).astype(jnp.bfloat16), w0_ref[...],
                preferred_element_type=jnp.float32) + bias0
    h = jnp.maximum(h, 0.0)

    # BatchNorm1d(hidden): single-pass stats, folded scale/shift.
    mean1 = jnp.sum(h, axis=0, keepdims=True) * inv_b
    var1 = jnp.maximum(
        jnp.sum(h * h, axis=0, keepdims=True) * inv_b - mean1 * mean1, 0.0)
    scale1 = g1 * lax.rsqrt(var1 + EPS)
    shift1 = b1 - mean1 * scale1

    # Linear1 + ReLU (lane-dense output store).
    y = jnp.dot((h * scale1 + shift1).astype(jnp.bfloat16), w1_ref[...],
                preferred_element_type=jnp.float32) + bias1
    out_ref[...] = jnp.maximum(y, 0.0).astype(out_ref.dtype)


def _batch_stats_kernel(x_ref, ps_ref):
    """Per-batch-tile partial sum / sum-of-squares of x (finalized in JAX)."""
    x = x_ref[...].astype(jnp.float32)
    s = jnp.sum(x, axis=0, keepdims=True)
    ss = jnp.sum(x * x, axis=0, keepdims=True)
    ps_ref[0] = jnp.concatenate([s, ss], axis=0)


def _layer0_kernel(x_ref, w0_ref, vec_ref, h_ref, ps_ref, *,
                   true_b, tile_b, needs_mask):
    """BN0 (folded) -> Linear0 -> ReLU for one batch tile, plus per-tile
    partial sum / sum-of-squares of h for the hidden BatchNorm."""
    x = x_ref[...].astype(jnp.float32)
    d_in = x.shape[1]
    hp = w0_ref.shape[1]
    scale0 = vec_ref[0:1, :d_in]   # g0 * rsqrt(var0 + eps)
    fbias0 = vec_ref[1:2, :hp]     # shift0 @ w0 + bias0   (bias folding)

    h = jnp.dot((x * scale0).astype(jnp.bfloat16), w0_ref[...],
                preferred_element_type=jnp.float32) + fbias0
    h = jnp.maximum(h, 0.0)

    if needs_mask:
        # Zero the zero-padded batch rows so the hidden-BN statistics stay
        # unbiased (padded x rows are zero but relu(fbias0) is not).
        row = pl.program_id(0) * tile_b + lax.broadcasted_iota(
            jnp.int32, (tile_b, 1), 0)
        h = jnp.where(row < true_b, h, 0.0)

    h_ref[...] = h.astype(h_ref.dtype)
    s = jnp.sum(h, axis=0, keepdims=True)
    ss = jnp.sum(h * h, axis=0, keepdims=True)
    ps_ref[0] = jnp.concatenate([s, ss], axis=0)


def _layer1_kernel(h_ref, w1_ref, vec_ref, y_ref):
    """BN1 (folded) -> Linear1 -> ReLU for one batch tile (lane-dense store)."""
    h = h_ref[...].astype(jnp.float32)
    hp = h.shape[1]
    dp_out = w1_ref.shape[1]
    scale1 = vec_ref[0:1, :hp]       # g1 * rsqrt(var1 + eps)
    fbias1 = vec_ref[1:2, :dp_out]   # shift1 @ w1 + bias1
    y = jnp.dot((h * scale1).astype(jnp.bfloat16), w1_ref[...],
                preferred_element_type=jnp.float32) + fbias1
    y_ref[...] = jnp.maximum(y, 0.0).astype(y_ref.dtype)


# ----------------------------------------------------------------------------
# Parameter preparation (one-time pad / pack / bf16 cast)
# ----------------------------------------------------------------------------
class PreparedParams(NamedTuple):
    w0: jax.Array       # (d_in, hp)     bf16, zero-padded hidden columns
    w1: jax.Array       # (hp, dp_out)   bf16, zero-padded rows / columns
    vec6: jax.Array     # (6, wmax)      f32 packed [g0, b0, bias0, g1, b1, bias1]
    g0: jax.Array       # (1, d_in)      f32
    b0: jax.Array       # (1, d_in)
    bias0: jax.Array    # (1, hp)
    g1: jax.Array       # (1, hp)
    b1: jax.Array       # (1, hp)
    bias1: jax.Array    # (1, dp_out)
    d_in: int
    d_out: int
    hp: int
    dp_out: int
    wmax: int


def prepare_params(raw, input_size, hidden_size, output_size):
    """One-time padding / packing / bf16 casting of the Encoder parameters."""
    hp = _round_up(hidden_size, LANE)
    dp_out = _round_up(output_size, LANE)
    wmax = max(input_size, hp, dp_out)

    w0 = jnp.zeros((input_size, hp), jnp.float32)
    w0 = w0.at[:, :hidden_size].set(raw["w0"]).astype(jnp.bfloat16)
    w1 = jnp.zeros((hp, dp_out), jnp.float32)
    w1 = w1.at[:hidden_size, :output_size].set(raw["w1"]).astype(jnp.bfloat16)

    g0, b0 = raw["g0"], raw["b0"]
    bias0 = _pad_cols(raw["bias0"], hp)
    g1 = _pad_cols(raw["g1"], hp)
    b1 = _pad_cols(raw["b1"], hp)
    bias1 = _pad_cols(raw["bias1"], dp_out)

    vec6 = jnp.concatenate(
        [_pad_cols(v, wmax) for v in (g0, b0, bias0, g1, b1, bias1)], axis=0)

    return PreparedParams(w0=w0, w1=w1, vec6=vec6, g0=g0, b0=b0, bias0=bias0,
                          g1=g1, b1=b1, bias1=bias1,
                          d_in=input_size, d_out=output_size,
                          hp=hp, dp_out=dp_out, wmax=wmax)


# ----------------------------------------------------------------------------
# Forward wrappers
# ----------------------------------------------------------------------------
def _fused_forward(x, p):
    B, d_in = x.shape
    hp, dp_out = p.hp, p.dp_out
    flops = 2 * B * (d_in * hp + hp * dp_out)
    bytes_accessed = (4 * B * (d_in + dp_out)
                      + 2 * (p.w0.size + p.w1.size) + 4 * p.vec6.size)
    y = pl.pallas_call(
        _fused_kernel,
        out_shape=jax.ShapeDtypeStruct((B, dp_out), jnp.float32),
        grid=(),
        in_specs=[pl.BlockSpec((B, d_in), lambda: (0, 0)),
                  pl.BlockSpec((d_in, hp), lambda: (0, 0)),
                  pl.BlockSpec((hp, dp_out), lambda: (0, 0)),
                  pl.BlockSpec((6, p.wmax), lambda: (0, 0))],
        out_specs=pl.BlockSpec((B, dp_out), lambda: (0, 0)),
        compiler_params=pltpu.CompilerParams(vmem_limit_bytes=VMEM_LIMIT_BYTES),
        cost_estimate=pl.CostEstimate(flops=flops, transcendentals=d_in + hp,
                                      bytes_accessed=bytes_accessed),
    )(x, p.w0, p.w1, p.vec6)
    # TODO(synk): let downstream consumers accept the padded (B, dp_out)
    # output to skip this extra HBM pass when d_out isn't a multiple of 128.
    return y[:, :p.d_out]


def _tiled_forward(x, p, tb_max):
    B, d_in = x.shape
    hp, dp_out = p.hp, p.dp_out
    tb = min(_round_up(B, 8), _round_up(tb_max, 8))
    bp = _round_up(B, tb)
    nt = bp // tb
    needs_mask = bp != B

    xp = x if bp == B else jnp.pad(x, ((0, bp - B), (0, 0)))
    cparams = pltpu.CompilerParams(dimension_semantics=("parallel",),
                                   vmem_limit_bytes=VMEM_LIMIT_BYTES)

    # ---- pass 1: per-tile partial batch statistics of x --------------------
    ps0 = pl.pallas_call(
        _batch_stats_kernel,
        out_shape=jax.ShapeDtypeStruct((nt, 2, d_in), jnp.float32),
        grid=(nt,),
        in_specs=[pl.BlockSpec((tb, d_in), lambda i: (i, 0))],
        out_specs=pl.BlockSpec((1, 2, d_in), lambda i: (i, 0, 0)),
        compiler_params=cparams,
        cost_estimate=pl.CostEstimate(
            flops=3 * bp * d_in, transcendentals=0,
            bytes_accessed=4 * (bp * d_in + nt * 2 * d_in)),
    )(xp)
    mean0 = jnp.sum(ps0[:, 0, :], axis=0, keepdims=True) / B
    var0 = jnp.maximum(
        jnp.sum(ps0[:, 1, :], axis=0, keepdims=True) / B - mean0 * mean0, 0.0)
    scale0 = p.g0 * lax.rsqrt(var0 + EPS)
    shift0 = p.b0 - mean0 * scale0
    fbias0 = jnp.dot(shift0, p.w0.astype(jnp.float32)) + p.bias0       # (1, hp)
    w0v = max(d_in, hp)
    vec0 = jnp.concatenate([_pad_cols(scale0, w0v), _pad_cols(fbias0, w0v)], 0)

    # ---- pass 2: BN0 -> Linear0 -> ReLU + partial hidden statistics --------
    kernel0 = functools.partial(_layer0_kernel, true_b=B, tile_b=tb,
                                needs_mask=needs_mask)
    h, ps1 = pl.pallas_call(
        kernel0,
        out_shape=(jax.ShapeDtypeStruct((bp, hp), jnp.bfloat16),
                   jax.ShapeDtypeStruct((nt, 2, hp), jnp.float32)),
        grid=(nt,),
        in_specs=[pl.BlockSpec((tb, d_in), lambda i: (i, 0)),
                  pl.BlockSpec((d_in, hp), lambda i: (0, 0)),   # resident
                  pl.BlockSpec((2, w0v), lambda i: (0, 0))],    # resident
        out_specs=(pl.BlockSpec((tb, hp), lambda i: (i, 0)),
                   pl.BlockSpec((1, 2, hp), lambda i: (i, 0, 0))),
        compiler_params=cparams,
        cost_estimate=pl.CostEstimate(
            flops=2 * bp * d_in * hp, transcendentals=0,
            bytes_accessed=4 * bp * d_in + 2 * (d_in * hp + bp * hp)
                           + 4 * nt * 2 * hp),
    )(xp, p.w0, vec0)
    mean1 = jnp.sum(ps1[:, 0, :], axis=0, keepdims=True) / B
    var1 = jnp.maximum(
        jnp.sum(ps1[:, 1, :], axis=0, keepdims=True) / B - mean1 * mean1, 0.0)
    scale1 = p.g1 * lax.rsqrt(var1 + EPS)
    shift1 = p.b1 - mean1 * scale1
    fbias1 = jnp.dot(shift1, p.w1.astype(jnp.float32)) + p.bias1   # (1, dp_out)
    w1v = max(hp, dp_out)
    vec1 = jnp.concatenate([_pad_cols(scale1, w1v), _pad_cols(fbias1, w1v)], 0)

    # ---- pass 3: BN1 -> Linear1 -> ReLU (lane-dense store) ------------------
    y = pl.pallas_call(
        _layer1_kernel,
        out_shape=jax.ShapeDtypeStruct((bp, dp_out), jnp.float32),
        grid=(nt,),
        in_specs=[pl.BlockSpec((tb, hp), lambda i: (i, 0)),
                  pl.BlockSpec((hp, dp_out), lambda i: (0, 0)),  # resident
                  pl.BlockSpec((2, w1v), lambda i: (0, 0))],     # resident
        out_specs=pl.BlockSpec((tb, dp_out), lambda i: (i, 0)),
        compiler_params=cparams,
        cost_estimate=pl.CostEstimate(
            flops=2 * bp * hp * dp_out, transcendentals=0,
            bytes_accessed=2 * (bp * hp + hp * dp_out) + 4 * bp * dp_out),
    )(h, p.w1, vec1)
    return y[:B, :p.d_out]


def encoder_forward(x, prep, *, tb_max=1024, force_tiled=False):
    """Encoder forward (training-mode BatchNorm batch statistics).

    Small batches: one fused kernel (single launch, one packed parameter DMA).
    Large batches: batch-tiled three-pass structure with a "parallel" batch
    grid axis (megacore on v7x) and resident weights / packed vectors.
    Tune tb_max per chip: >=512 on v5e, >=256 on v6e, 4096-8192 on v7x.
    """
    assert x.ndim == 2 and x.shape[1] == prep.d_in
    B = x.shape[0]
    fused_bytes = (4 * B * (prep.d_in + 2 * prep.hp + 2 * prep.dp_out)
                   + 2 * (prep.w0.size + prep.w1.size) + 4 * prep.vec6.size)
    if not force_tiled and fused_bytes <= FUSED_PATH_MAX_BYTES:
        return _fused_forward(x, prep)
    return _tiled_forward(x, prep, tb_max)


# ----------------------------------------------------------------------------
# Synthetic parameters + pure-JAX reference
# ----------------------------------------------------------------------------
def init_params(key, input_size, hidden_size, output_size):
    """Deterministic synthetic parameters. Linear weights pre-transposed as
    (in_features, out_features); biases / BN affine params as (1, F)."""
    k = jax.random.split(key, 6)
    return {
        "g0": jax.random.normal(k[0], (1, input_size), jnp.float32) * 0.1 + 1.0,
        "b0": jax.random.normal(k[1], (1, input_size), jnp.float32) * 0.1,
        "w0": jax.random.normal(k[2], (input_size, hidden_size), jnp.float32)
              * (1.0 / jnp.sqrt(input_size)),
        "bias0": jax.random.normal(k[3], (1, hidden_size), jnp.float32) * 0.05,
        "g1": jax.random.normal(k[4], (1, hidden_size), jnp.float32) * 0.1 + 1.0,
        "b1": jax.random.normal(k[5], (1, hidden_size), jnp.float32) * 0.1,
        "w1": jax.random.normal(jax.random.fold_in(key, 7),
                                (hidden_size, output_size), jnp.float32)
              * (1.0 / jnp.sqrt(hidden_size)),
        "bias1": jax.random.normal(jax.random.fold_in(key, 8),
                                   (1, output_size), jnp.float32) * 0.05,
    }


def encoder_reference(x, p):
    """Pure-JAX f32 reference mirroring the PyTorch forward (training-mode BN)."""
    m0 = jnp.mean(x, axis=0, keepdims=True)
    v0 = jnp.mean((x - m0) ** 2, axis=0, keepdims=True)
    xn = (x - m0) / jnp.sqrt(v0 + EPS) * p["g0"] + p["b0"]
    h = jnp.maximum(xn @ p["w0"] + p["bias0"], 0.0)
    m1 = jnp.mean(h, axis=0, keepdims=True)
    v1 = jnp.mean((h - m1) ** 2, axis=0, keepdims=True)
    hn = (h - m1) / jnp.sqrt(v1 + EPS) * p["g1"] + p["b1"]
    return jnp.maximum(hn @ p["w1"] + p["bias1"], 0.0)


if __name__ == "__main__":
    B, INPUT, HIDDEN, OUTPUT = 8, 32, 64, 16

    key = jax.random.PRNGKey(0)
    kx, kx2, kp = jax.random.split(key, 3)

    raw = init_params(kp, INPUT, HIDDEN, OUTPUT)
    prep = prepare_params(raw, INPUT, HIDDEN, OUTPUT)

    # Small batch -> fused single-launch path.
    x = jax.random.normal(kx, (B, INPUT), jnp.float32)
    out = jax.block_until_ready(encoder_forward(x, prep))
    ref = encoder_reference(x, raw)
    assert out.shape == (B, OUTPUT)
    # bf16 MXU operands (f32 accumulate) -> ~1e-3 relative error vs pure-f32.
    assert jnp.allclose(out, ref, atol=5e-2, rtol=5e-2), "fused path mismatch"
    assert bool(jnp.all(out >= 0.0)), "final ReLU violated (fused path)"

    # Larger batch forced through the batch-tiled path (multiple tiles plus a
    # partial last tile, exercising the hidden-stat row masking).
    B2 = 600
    x2 = jax.random.normal(kx2, (B2, INPUT), jnp.float32)
    out2 = jax.block_until_ready(
        encoder_forward(x2, prep, tb_max=256, force_tiled=True))
    ref2 = encoder_reference(x2, raw)
    assert out2.shape == (B2, OUTPUT)
    assert jnp.allclose(out2, ref2, atol=5e-2, rtol=5e-2), "tiled path mismatch"
    assert bool(jnp.all(out2 >= 0.0)), "final ReLU violated (tiled path)"

    print("KERNEL_OK")
</pallas_src>

<mosaic_0001>
module attributes {stable_mosaic.version = 11 : i64} {
  func.func @_fused_kernel(%arg0: memref<8x32xf32, #tpu.memory_space<vmem>>, %arg1: memref<32x128xbf16, #tpu.memory_space<vmem>>, %arg2: memref<128x128xbf16, #tpu.memory_space<vmem>>, %arg3: memref<6x128xf32, #tpu.memory_space<vmem>>, %arg4: memref<8x128xf32, #tpu.memory_space<vmem>>) attributes {dimension_semantics = [], scalar_prefetch = 0 : i64, scratch_operands = 0 : i64, tpu.core_type = #tpu.core_type<tc>} {
    %c0 = arith.constant 0 : index
    %c0_0 = arith.constant 0 : index
    %0 = vector.load %arg0[%c0, %c0_0] : memref<8x32xf32, #tpu.memory_space<vmem>>, vector<8x32xf32>
    %c0_1 = arith.constant 0 : index
    %c0_2 = arith.constant 0 : index
    %1 = vector.load %arg3[%c0_1, %c0_2] : memref<6x128xf32, #tpu.memory_space<vmem>>, vector<1x32xf32>
    %c1 = arith.constant 1 : index
    %c0_3 = arith.constant 0 : index
    %2 = vector.load %arg3[%c1, %c0_3] : memref<6x128xf32, #tpu.memory_space<vmem>>, vector<1x32xf32>
    %c2 = arith.constant 2 : index
    %c0_4 = arith.constant 0 : index
    %3 = vector.load %arg3[%c2, %c0_4] : memref<6x128xf32, #tpu.memory_space<vmem>>, vector<1x128xf32>
    %c3 = arith.constant 3 : index
    %c0_5 = arith.constant 0 : index
    %4 = vector.load %arg3[%c3, %c0_5] : memref<6x128xf32, #tpu.memory_space<vmem>>, vector<1x128xf32>
    %c4 = arith.constant 4 : index
    %c0_6 = arith.constant 0 : index
    %5 = vector.load %arg3[%c4, %c0_6] : memref<6x128xf32, #tpu.memory_space<vmem>>, vector<1x128xf32>
    %c5 = arith.constant 5 : index
    %c0_7 = arith.constant 0 : index
    %6 = vector.load %arg3[%c5, %c0_7] : memref<6x128xf32, #tpu.memory_space<vmem>>, vector<1x128xf32>
    %cst = arith.constant dense<0.000000e+00> : vector<32xf32>
    %7 = vector.multi_reduction <add>, %0, %cst [0] : vector<8x32xf32> to vector<32xf32>
    %8 = vector.shape_cast %7 : vector<32xf32> to vector<1x32xf32>
    %cst_8 = arith.constant 1.250000e-01 : f32
    %9 = vector.broadcast %cst_8 : f32 to vector<1x32xf32>
    %10 = arith.mulf %8, %9 : vector<1x32xf32>
    %11 = arith.mulf %0, %0 : vector<8x32xf32>
    %cst_9 = arith.constant dense<0.000000e+00> : vector<32xf32>
    %12 = vector.multi_reduction <add>, %11, %cst_9 [0] : vector<8x32xf32> to vector<32xf32>
    %13 = vector.shape_cast %12 : vector<32xf32> to vector<1x32xf32>
    %cst_10 = arith.constant 1.250000e-01 : f32
    %14 = vector.broadcast %cst_10 : f32 to vector<1x32xf32>
    %15 = arith.mulf %13, %14 : vector<1x32xf32>
    %16 = arith.mulf %10, %10 : vector<1x32xf32>
    %17 = arith.subf %15, %16 : vector<1x32xf32>
    %cst_11 = arith.constant 0.000000e+00 : f32
    %18 = vector.broadcast %cst_11 : f32 to vector<1x32xf32>
    %19 = arith.maximumf %17, %18 : vector<1x32xf32>
    %cst_12 = arith.constant 9.99999974E-6 : f32
    %20 = vector.broadcast %cst_12 : f32 to vector<1x32xf32>
    %21 = arith.addf %19, %20 : vector<1x32xf32>
    %22 = math.rsqrt %21 : vector<1x32xf32>
    %23 = arith.mulf %1, %22 : vector<1x32xf32>
    %24 = arith.mulf %10, %23 : vector<1x32xf32>
    %25 = arith.subf %2, %24 : vector<1x32xf32>
    %26 = vector.broadcast %23 : vector<1x32xf32> to vector<8x32xf32>
    %27 = arith.mulf %0, %26 : vector<8x32xf32>
    %28 = vector.broadcast %25 : vector<1x32xf32> to vector<8x32xf32>
    %29 = arith.addf %27, %28 : vector<8x32xf32>
    %30 = arith.truncf %29 : vector<8x32xf32> to vector<8x32xbf16>
    %c0_13 = arith.constant 0 : index
    %c0_14 = arith.constant 0 : index
    %31 = vector.load %arg1[%c0_13, %c0_14] : memref<32x128xbf16, #tpu.memory_space<vmem>>, vector<32x128xbf16>
    %cst_15 = arith.constant dense<0.000000e+00> : vector<8x128xf32>
    %32 = tpu.matmul %30, %31, %cst_15 {dimension_numbers = #tpu.dot_dimension_numbers<[1], [0], [0], [1], [0, 0, 1, 1], [], []>} : vector<8x32xbf16>, vector<32x128xbf16>, vector<8x128xf32> -> vector<8x128xf32>
    %33 = vector.broadcast %3 : vector<1x128xf32> to vector<8x128xf32>
    %34 = arith.addf %32, %33 : vector<8x128xf32>
    %cst_16 = arith.constant 0.000000e+00 : f32
    %35 = vector.broadcast %cst_16 : f32 to vector<8x128xf32>
    %36 = arith.maximumf %34, %35 : vector<8x128xf32>
    %cst_17 = arith.constant dense<0.000000e+00> : vector<128xf32>
    %37 = vector.multi_reduction <add>, %36, %cst_17 [0] : vector<8x128xf32> to vector<128xf32>
    %38 = vector.shape_cast %37 : vector<128xf32> to vector<1x128xf32>
    %cst_18 = arith.constant 1.250000e-01 : f32
    %39 = vector.broadcast %cst_18 : f32 to vector<1x128xf32>
    %40 = arith.mulf %38, %39 : vector<1x128xf32>
    %41 = arith.mulf %36, %36 : vector<8x128xf32>
    %cst_19 = arith.constant dense<0.000000e+00> : vector<128xf32>
    %42 = vector.multi_reduction <add>, %41, %cst_19 [0] : vector<8x128xf32> to vector<128xf32>
    %43 = vector.shape_cast %42 : vector<128xf32> to vector<1x128xf32>
    %cst_20 = arith.constant 1.250000e-01 : f32
    %44 = vector.broadcast %cst_20 : f32 to vector<1x128xf32>
    %45 = arith.mulf %43, %44 : vector<1x128xf32>
    %46 = arith.mulf %40, %40 : vector<1x128xf32>
    %47 = arith.subf %45, %46 : vector<1x128xf32>
    %cst_21 = arith.constant 0.000000e+00 : f32
    %48 = vector.broadcast %cst_21 : f32 to vector<1x128xf32>
    %49 = arith.maximumf %47, %48 : vector<1x128xf32>
    %cst_22 = arith.constant 9.99999974E-6 : f32
    %50 = vector.broadcast %cst_22 : f32 to vector<1x128xf32>
    %51 = arith.addf %49, %50 : vector<1x128xf32>
    %52 = math.rsqrt %51 : vector<1x128xf32>
    %53 = arith.mulf %4, %52 : vector<1x128xf32>
    %54 = arith.mulf %40, %53 : vector<1x128xf32>
    %55 = arith.subf %5, %54 : vector<1x128xf32>
    %56 = vector.broadcast %53 : vector<1x128xf32> to vector<8x128xf32>
    %57 = arith.mulf %36, %56 : vector<8x128xf32>
    %58 = vector.broadcast %55 : vector<1x128xf32> to vector<8x128xf32>
    %59 = arith.addf %57, %58 : vector<8x128xf32>
    %60 = arith.truncf %59 : vector<8x128xf32> to vector<8x128xbf16>
    %c0_23 = arith.constant 0 : index
    %c0_24 = arith.constant 0 : index
    %61 = vector.load %arg2[%c0_23, %c0_24] : memref<128x128xbf16, #tpu.memory_space<vmem>>, vector<128x128xbf16>
    %cst_25 = arith.constant dense<0.000000e+00> : vector<8x128xf32>
    %62 = tpu.matmul %60, %61, %cst_25 {dimension_numbers = #tpu.dot_dimension_numbers<[1], [0], [0], [1], [0, 0, 1, 1], [], []>} : vector<8x128xbf16>, vector<128x128xbf16>, vector<8x128xf32> -> vector<8x128xf32>
    %63 = vector.broadcast %6 : vector<1x128xf32> to vector<8x128xf32>
    %64 = arith.addf %62, %63 : vector<8x128xf32>
    %cst_26 = arith.constant 0.000000e+00 : f32
    %65 = vector.broadcast %cst_26 : f32 to vector<8x128xf32>
    %66 = arith.maximumf %64, %65 : vector<8x128xf32>
    %c0_27 = arith.constant 0 : index
    %c0_28 = arith.constant 0 : index
    %67 = vector.load %arg4[%c0_27, %c0_28] : memref<8x128xf32, #tpu.memory_space<vmem>>, vector<8x128xf32>
    tpu.vector_store %arg4[%c0_27, %c0_28], %66 {strides = array<i32>} : memref<8x128xf32, #tpu.memory_space<vmem>>, vector<8x128xf32>,
    return
  }
}

</mosaic_0001>

<bundles_post_ra>
// kernel: tpu_custom_call.1
= control target key start
LH: loop header
LB: loop body
LE: loop exit
PB: predicated region body
PF: predicated region fallthrough
CT: control target
= control target key end

     0   :  { %9 = vsyncpa [#allocation3], 0  ;;  %s593_s0 = inlined_call_operand.hbm [shape: f32[8,32], index: 0, kind: input, shape index: {}]   ;;  %s594_s1 = inlined_call_operand.hbm [shape: bf16[32,128], index: 1, kind: input, shape index: {}]   ;;  %s595_s2 = inlined_call_operand.hbm [shape: bf16[128,128], index: 2, kind: input, shape index: {}]   ;;  %s596_s3 = inlined_call_operand.hbm [shape: f32[6,128], index: 3, kind: input, shape index: {}]   ;;  %s597_s4 = inlined_call_operand.hbm [shape: f32[8,128], index: 4, kind: output, shape index: {}]  }
   0x1   :  { %10 = vsyncpa [#allocation6], 0 }
   0x2   :  { %11 = vsyncpa [#allocation9], 0 }
   0x3   :  { %12 = vsyncpa [#allocation4], 0  ;;  %s523_s15 = smov [#allocation5]  }
   0x4   :  { %s28_s16 = sshll.u32 %s523_s15, 4  ;;  %s29_s16 = int_to_ptr.vmem [resolvable:$true] %s28_s16 }
   0x5   :  { %s423_s17 = scalar_lea.vmem %s29_s16, 256  ;;  %p428_p1 = scmp.lt.s32.totalorder %s29_s16, %s29_s16 }
   0x6   :  { %p424_p0 = scmp.ne.s32.totalorder %s29_s16, %s423_s17  ;;  %p429_p2 = scmp.lt.s32.totalorder %s423_s17, %s423_s17 }
   0x8   :  { %p430_p3 = por %p429_p2, %p428_p1 }
   0xa   :  { %p431_p4 = pnand %p430_p3, %p424_p0 }
   0xc   :  { %434 = shalt.err (!%p431_p4)
}
   0xd   :  { %s524_s18 = smov 64   ;;  %s525_s19 = smov 4  }
   0xe   :  { %34 = dma.hbm_to_vmem [thread:$0]  %s594_s1, 256, %s29_s16, [#allocation6], %s524_s18, %s524_s18, %s525_s19  }
   0xf   :  { %s526_s22 = smov [#allocation2]   ;;  %s527_s24 = smov [#allocation7]  }
  0x10   :  { %s19_s23 = sshll.u32 %s526_s22, 4  ;;  %s40_s25 = sshll.u32 %s527_s24, 4  ;;  %s20_s23 = int_to_ptr.vmem [resolvable:$true] %s19_s23  ;;  %s41_s25 = int_to_ptr.vmem [resolvable:$true] %s40_s25 }
  0x11   :  { %s443_s26 = scalar_lea.vmem %s20_s23, 128  ;;  %p448_p6 = scmp.lt.s32.totalorder %s20_s23, %s20_s23 }
  0x12   :  { %p444_p5 = scmp.ne.s32.totalorder %s20_s23, %s443_s26  ;;  %p449_p7 = scmp.lt.s32.totalorder %s443_s26, %s443_s26 }
  0x14   :  { %p450_p8 = por %p449_p7, %p448_p6 }
  0x16   :  { %p451_p9 = pnand %p450_p8, %p444_p5 }
  0x18   :  { %454 = shalt.err (!%p451_p9)
}
  0x19   :  { %22 = dma.hbm_to_vmem [thread:$0]  %s593_s0, 128, %s20_s23, [#allocation3]  }
  0x1a   :  { %s463_s29 = scalar_lea.vmem %s41_s25, 1024  ;;  %p468_p11 = scmp.lt.s32.totalorder %s41_s25, %s41_s25 }
  0x1b   :  { %p464_p10 = scmp.ne.s32.totalorder %s41_s25, %s463_s29  ;;  %p469_p12 = scmp.lt.s32.totalorder %s463_s29, %s463_s29 }
  0x1d   :  { %p470_p13 = por %p469_p12, %p468_p11 }
  0x1f   :  { %p471_p0 = pnand %p470_p13, %p464_p10 }
  0x21   :  { %474 = shalt.err (!%p471_p0)
}
  0x22   :  { %46 = dma.hbm_to_vmem [thread:$0]  %s595_s2, 1024, %s41_s25, [#allocation6], %s524_s18, %s524_s18, %s525_s19  }
  0x23   :  { %s528_s5 = smov [#allocation8]  }
  0x24   :  { %s53_s6 = sshll.u32 %s528_s5, 4  ;;  %s54_s6 = int_to_ptr.vmem [resolvable:$true] %s53_s6 }
  0x25   :  { %s483_s7 = scalar_lea.vmem %s54_s6, 128  ;;  %p488_p2 = scmp.lt.s32.totalorder %s54_s6, %s54_s6 }
  0x26   :  { %p484_p1 = scmp.ne.s32.totalorder %s54_s6, %s483_s7  ;;  %p489_p3 = scmp.lt.s32.totalorder %s483_s7, %s483_s7 }
  0x28   :  { %p490_p4 = por %p489_p3, %p488_p2 }
  0x2a   :  { %p491_p5 = pnand %p490_p4, %p484_p1 }
  0x2c   :  { %494 = shalt.err (!%p491_p5)
}
  0x2d   :  { %56 = dma.hbm_to_vmem [thread:$0]  %s596_s3, 128, %s54_s6, [#allocation9]  }
  0x2e   :  { %515 = dma.done.wait [#allocation3], 128  }
  0x2f   :  { %516 = vsyncadd [#allocation3], 4294967168 }
  0x30   :  { %517 = dma.done.wait [#allocation6], 1280  }
  0x31   :  { %518 = vsyncadd [#allocation6], 4294966016 }
  0x32   :  { %519 = dma.done.wait [#allocation9], 128  }
  0x33   :  { %520 = vsyncadd [#allocation9], 4294967168  ;;  %v529_v0 = vmov 0.0   ;;  %vm530_vm0 = vmmov 0   ;;  %v401_v1 = vld [vmem:[#allocation5 + $0x8] sm:$0xff]   ;;  %vm77_vm1 = vcmask 261120   ;;  %v103_v25 = vlaneseq }
  0x34   :  { %364 = vmatprep.subr.bf16.mxu0 %v529_v0  ;;  %368 = vmatprep.mubr.msk.bf16.mxu0 %vm530_vm0, %v529_v0  ;;  %v402_v2 = vld [vmem:[#allocation5] sm:$0xff]   ;;  %v70_v3 = vld [vmem:[#allocation2] sm:$0xff]  ;;  %v71_v27 = vld [vmem:[#allocation8] sm:$0x1]  ;;  %s531_s2 = smov [#allocation10]  }
  0x35   :  { %372 = vmatprep.subr.bf16.mxu1 %v529_v0  ;;  %388 = vmatprep.mubr.msk.bf16.mxu1 %vm530_vm0, %v529_v0  ;;  %v78_v4 = vsel %vm77_vm1, %v70_v3, 0.0  ;;  %v86_v5 = vmul.f32 %v70_v3, %v70_v3  ;;  %v104_v26 = vshrl.u32 %v103_v25, 7  ;;  %v72_v31 = vld [vmem:[#allocation8 + $0x1] sm:$0x1]  ;;  %v403_v39 = vld [vmem:[#allocation7 + $0x38] sm:$0xff]   ;;  %v404_v40 = vld [vmem:[#allocation7 + $0x30] sm:$0xff]  }
  0x36   :  { %365 = vmatpush3.bf16.msra.mxu0 %v401_v1  ;;  %v79_v6 = vrot.slane %v78_v4, 4  ;;  %373 = vmatpush3.bf16.msra.mxu1 %v403_v39  ;;  %v405_v41 = vld [vmem:[#allocation7 + $0x28] sm:$0xff]   ;;  %v406_v42 = vld [vmem:[#allocation7 + $0x20] sm:$0xff]   ;;  %v407_v43 = vld [vmem:[#allocation7 + $0x18] sm:$0xff]   ;;  %s328_s3 = sshll.u32 %s531_s2, 4  ;;  %s329_s3 = int_to_ptr.vmem [resolvable:$true] %s328_s3 }
  0x37   :  { %366 = vmatprep.subr.bf16.mxu0 %v529_v0  ;;  %v87_v7 = vsel %vm77_vm1, %v86_v5, 0.0  ;;  %v576_v28 = vsub.s32 0, %v104_v26  ;;  %374 = vmatprep.subr.bf16.mxu1 %v529_v0  ;;  %v408_v44 = vld [vmem:[#allocation7 + $0x10] sm:$0xff]   ;;  %v409_v45 = vld [vmem:[#allocation7 + $0x8] sm:$0xff]   ;;  %v410_v46 = vld [vmem:[#allocation7] sm:$0xff]   ;;  %s495_s9 = scalar_lea.vmem %s329_s3, 128  ;;  %p500_p7 = scmp.lt.s32.totalorder %s329_s3, %s329_s3 }
  0x38   :  { %v80_v8 = vadd.f32 %v79_v6, %v78_v4  ;;  %v88_v9 = vrot.slane %v87_v7, 4  ;;  %v339_v47 = vld [vmem:[#allocation8 + $0x2] ss:$0 sm:$0xff]  ;;  %p496_p6 = scmp.ne.s32.totalorder %s329_s3, %s495_s9  ;;  %p501_p8 = scmp.lt.s32.totalorder %s495_s9, %s495_s9 }
  0x3a   :  { %367 = vmatpush3.bf16.msra.mxu0 %v402_v2  ;;  %v81_v10 = vrot.slane %v80_v8, 2  ;;  %v89_v11 = vadd.f32 %v88_v9, %v87_v7  ;;  %375 = vmatpush3.bf16.msra.mxu1 %v404_v40  ;;  %v74_v9 = vld [vmem:[#allocation8 + $0x3] sm:$0x1]  ;;  %p502_p9 = por %p501_p8, %p500_p7 }
  0x3b   :  { %376 = vmatprep.subr.bf16.mxu1 %v529_v0 }
  0x3c   :  { %v82_v12 = vadd.f32 %v81_v10, %v80_v8  ;;  %v90_v13 = vrot.slane %v89_v11, 2  ;;  %p503_p10 = pnand %p502_p9, %p496_p6 }
  0x3e   :  { %v83_v14 = vrot.slane %v82_v12, 1  ;;  %v91_v15 = vadd.f32 %v90_v13, %v89_v11  ;;  %377 = vmatpush3.bf16.msra.mxu1 %v405_v41 }
  0x3f   :  { %378 = vmatprep.subr.bf16.mxu1 %v529_v0 }
  0x40   :  { %v84_v16 = vadd.f32 %v83_v14, %v82_v12  ;;  %v92_v17 = vrot.slane %v91_v15, 1  ;;  %v75_v12 = vld [vmem:[#allocation8 + $0x4] sm:$0x1] }
  0x42   :  { %v85_v18 = vmul.f32 0.125, %v84_v16  ;;  %v93_v19 = vadd.f32 %v92_v17, %v91_v15  ;;  %379 = vmatpush3.bf16.msra.mxu1 %v406_v42 }
  0x43   :  { %380 = vmatprep.subr.bf16.mxu1 %v529_v0 }
  0x44   :  { %v94_v20 = vmul.f32 0.125, %v93_v19  ;;  %v95_v21 = vmul.f32 %v85_v18, %v85_v18 }
  0x46   :  { %v96_v22 = vsub.f32 %v94_v20, %v95_v21  ;;  %381 = vmatpush3.bf16.msra.mxu1 %v407_v43  ;;  %v343_v20 = vld [vmem:[#allocation8 + $0x5] ss:$0 sm:$0xff] }
  0x47   :  { %382 = vmatprep.subr.bf16.mxu1 %v529_v0 }
  0x48   :  { %v97_v23 = vmax.f32 %v96_v22, 0.0 }
  0x4a   :  { %v98_v24 = vadd.f32 1e-05, %v97_v23  ;;  %383 = vmatpush3.bf16.msra.mxu1 %v408_v44 }
  0x4b   :  { %384 = vmatprep.subr.bf16.mxu1 %v529_v0 }
  0x4c   :  { %411 = vrsqrt.f32 %v98_v24 }
  0x4e   :  { %385 = vmatpush3.bf16.msra.mxu1 %v409_v45 }
  0x4f   :  { %386 = vmatprep.subr.bf16.mxu1 %v529_v0 }
  0x52   :  { %387 = vmatpush3.bf16.msra.mxu1 %v410_v46 }
  0x59   :  { %v412_v29 = vpop.eup %411 }
  0x5a   :  { %v100_v30 = vmul.f32 %v412_v29, %v71_v27 }
  0x5c   :  { %v101_v32 = vmul.f32 %v100_v30, %v85_v18  ;;  %v106_v33 = vrot.slane %v100_v30, %v576_v28 }
  0x5e   :  { %v102_v34 = vsub.f32 %v72_v31, %v101_v32  ;;  %v107_v35 = vmul.f32 %v106_v33, %v70_v3 }
  0x60   :  { %v111_v36 = vrot.slane %v102_v34, %v576_v28 }
  0x62   :  { %v112_v37 = vadd.f32 %v111_v36, %v107_v35 }
  0x64   :  { %v113_v38 = vpack.c.bf16 %v112_v37, %v112_v37 }
  0x66   :  { %369 = vmatmul.mubr.msk.bf16.vlgmr.msra.gmra.mxu0 %vm77_vm1, %v113_v38 }
 0x126   :  { %v171_v48 = vpop.f32.mrf.mxu0 }
 0x127   :  { %v172_v49 = vadd.f32 %v339_v47, %v171_v48 }
 0x128   :  { %v370_v50 = vpop.f32.mrf.mxu0 }
 0x129   :  { %v177_v51 = vmax.f32 %v172_v49, 0.0 }
 0x12a   :  { %v174_v52 = vpop.f32.mrf.mxu0 }
 0x12b   :  { %v178_v53 = vrot.slane %v177_v51, 4  ;;  %v185_v54 = vmul.f32 %v177_v51, %v177_v51 }
 0x12c   :  { %v371_v55 = vpop.f32.mrf.mxu0 }
 0x12d   :  { %v179_v56 = vadd.f32 %v178_v53, %v177_v51  ;;  %v186_v57 = vrot.slane %v185_v54, 4 }
 0x12f   :  { %v180_v58 = vrot.slane %v179_v56, 2  ;;  %v187_v59 = vadd.f32 %v186_v57, %v185_v54 }
 0x131   :  { %v181_v60 = vadd.f32 %v180_v58, %v179_v56  ;;  %v188_v61 = vrot.slane %v187_v59, 2 }
 0x133   :  { %v182_v62 = vrot.slane %v181_v60, 1  ;;  %v189_v63 = vadd.f32 %v188_v61, %v187_v59 }
 0x135   :  { %v190_v1 = vrot.slane %v189_v63, 1  ;;  %v183_v0 = vadd.f32 %v182_v62, %v181_v60 }
 0x137   :  { %v191_v2 = vadd.f32 %v190_v1, %v189_v63  ;;  %v184_v3 = vmul.f32 0.125, %v183_v0 }
 0x139   :  { %v192_v4 = vmul.f32 0.125, %v191_v2  ;;  %v193_v5 = vmul.f32 %v184_v3, %v184_v3 }
 0x13b   :  { %v194_v6 = vsub.f32 %v192_v4, %v193_v5 }
 0x13d   :  { %v195_v7 = vmax.f32 %v194_v6, 0.0 }
 0x13f   :  { %v196_v8 = vadd.f32 1e-05, %v195_v7 }
 0x141   :  { %413 = vrsqrt.f32 %v196_v8 }
 0x14e   :  { %v414_v10 = vpop.eup %413 }
 0x14f   :  { %v198_v11 = vmul.f32 %v414_v10, %v74_v9 }
 0x151   :  { %v199_v13 = vmul.f32 %v198_v11, %v184_v3  ;;  %v204_v14 = vrot.slane %v198_v11, %v576_v28 }
 0x153   :  { %v200_v15 = vsub.f32 %v75_v12, %v199_v13  ;;  %v205_v16 = vmul.f32 %v204_v14, %v177_v51 }
 0x155   :  { %v209_v17 = vrot.slane %v200_v15, %v576_v28 }
 0x157   :  { %v210_v18 = vadd.f32 %v209_v17, %v205_v16 }
 0x159   :  { %v211_v19 = vpack.c.bf16 %v210_v18, %v210_v18 }
 0x15b   :  { %389 = vmatmul.mubr.bf16.vlgmr.msra.gmra.mxu1 %v211_v19 }
 0x21b   :  { %v314_v21 = vpop.f32.mrf.mxu1 }
 0x21c   :  { %v315_v22 = vadd.f32 %v343_v20, %v314_v21 }
 0x21d   :  { %v390_v23 = vpop.f32.mrf.mxu1 }
 0x21e   :  { %v320_v24 = vmax.f32 %v315_v22, 0.0 }
 0x21f   :  { %v317_v25 = vpop.f32.mrf.mxu1 }
 0x220   :  { %321 = vst [vmem:[#allocation10] sm:$0xff] %v320_v24 }
 0x221   :  { %v391_v26 = vpop.f32.mrf.mxu1 }
 0x222   :  { %506 = shalt.err (!%p503_p10)
}
 0x223   :  { %331 = dma.vmem_to_hbm [thread:$0]  %s329_s3, 128, %s597_s4, [#allocation4]  }
 0x224   :  { %521 = dma.done.wait [#allocation4], 128  }
 0x225   :  { %522 = vsyncadd [#allocation4], 4294967168 }
 0x226   :  { %335 = vsyncpa [#allocation3], 1 }
 0x227   :  { %336 = vsyncpa [#allocation6], 1 }
 0x228   :  { %337 = vsyncpa [#allocation9], 1 }
 0x229   :  { %338 = vsyncpa [#allocation4], 1 }

</bundles_post_ra>
